<compile_context>
chip_gen: v7x
topology: tpu7x:2x2x1
jax: 0.10.0
libtpu: 0.0.40
codegen_flags: <defaults>
</compile_context>

<pallas_src>
import functools

import jax
import jax.numpy as jnp
from jax.experimental import pallas as pl
from jax.experimental.pallas import tpu as pltpu

IGNORE_INDEX = 255


def _ce2d_kernel(logits_ref, tgt_ref, w_ref, out_ref, *, hw):
    x = logits_ref[0].astype(jnp.float32)        # (C, TP) classes x pixels
    tgt = tgt_ref[0].astype(jnp.int32)           # (1, TP) target class ids
    w = w_ref[...].astype(jnp.float32)           # (C, 1)  per-class weight
    c, tp = x.shape

    # Numerically-stable log-sum-exp over the class (sublane) axis.
    m = jnp.max(x, axis=0, keepdims=True)                               # (1, TP)
    lse = jnp.log(jnp.sum(jnp.exp(x - m), axis=0, keepdims=True)) + m   # (1, TP)

    # Gather target logit and target-class weight via class-axis select+sum;
    # everything past this point is (1, TP) work (no (C,TP) multiplies,
    # subtracts or logical_ands).  Selects (not products) -> no 0*inf NaNs.
    cls = jax.lax.broadcasted_iota(jnp.int32, (c, tp), 0)               # class id rows
    onehot = cls == tgt                                                 # (C, TP)
    w_px = jnp.sum(jnp.where(onehot, w, 0.0), axis=0, keepdims=True)    # (1, TP)
    x_t = jnp.sum(jnp.where(onehot, x, 0.0), axis=0, keepdims=True)     # (1, TP)

    # Validity: ignore_index pixels and the ragged tail of the last tile
    # (tail columns hold garbage; they are masked, never padded in HBM).
    col = jax.lax.broadcasted_iota(jnp.int32, (1, tp), 1) + pl.program_id(1) * tp
    valid = jnp.logical_and(tgt != IGNORE_INDEX, col < hw)              # (1, TP)

    num_p = jnp.sum(jnp.where(valid, w_px * (lse - x_t), 0.0))   # weighted-NLL partial
    den_p = jnp.sum(jnp.where(valid, w_px, 0.0))                 # weight-sum partial

    # Lane-dense (2, 128) store: row 0 = num, row 1 = den (replicated 128x;
    # the replication factor cancels in the final num/den ratio).
    row = jax.lax.broadcasted_iota(jnp.int32, (2, 128), 0)
    out_ref[0] = jnp.where(row == 0, num_p, den_p).astype(jnp.float32)


@functools.partial(jax.jit, static_argnames=("tile_pixels",))
def cross_entropy_loss_2d(inputs, targets, class_weight, tile_pixels=None):
    """inputs: (N, C, H, W) float logits; targets: (N, H, W) int class ids."""
    n, c, h, w = inputs.shape
    hw = h * w

    # Free, contiguous reshapes.  Logits keep the caller's dtype (bf16 stays
    # bf16 -> half the dominant HBM stream); targets keep a narrow integer
    # dtype when possible (uint8 recommended for C <= 255; ignore_index=255
    # still fits) -- no wrapper casts that would add an extra HBM pass.
    logits = inputs.reshape(n, c, hw)
    if targets.dtype == jnp.uint8 and c <= 255:
        tgt = targets.reshape(n, 1, hw)
    elif targets.dtype == jnp.int32:
        tgt = targets.reshape(n, 1, hw)
    else:
        tgt = targets.reshape(n, 1, hw).astype(jnp.int32)
    weight = class_weight.astype(jnp.float32).reshape(c, 1)

    # Pixel-tile selection: lane-aligned (multiple of 128), sized so the
    # logits block is ~2 MiB in its stored dtype.  That is past the measured
    # >=85%-of-roofline knee while the double-buffered inputs plus f32
    # elementwise temporaries stay well inside the 32 MiB scoped-VMEM limit
    # below on every generation (v5e/v6e 128 MiB physical, v7x 64 MiB).
    if tile_pixels is None:
        itemsize = jnp.dtype(inputs.dtype).itemsize
        target_bytes = 2 * 1024 * 1024
        tp = (target_bytes // (itemsize * max(c, 1)) // 128) * 128
        tp = max(128, min(tp, 512 * 1024))
    else:
        tp = int(tile_pixels)
    if hw <= tp:
        tp, num_tiles = hw, 1          # full row: allowed regardless of alignment
    else:
        tp = max(128, (tp // 128) * 128)
        num_tiles = pl.cdiv(hw, tp)    # ragged tail handled in-kernel

    kernel = functools.partial(_ce2d_kernel, hw=hw)

    partials = pl.pallas_call(
        kernel,
        out_shape=jax.ShapeDtypeStruct((n, 2, num_tiles * 128), jnp.float32),
        grid_spec=pltpu.PrefetchScalarGridSpec(
            num_scalar_prefetch=0,
            grid=(n, num_tiles),
            in_specs=[
                pl.BlockSpec((1, c, tp), lambda i, j: (i, 0, j)),   # logits
                pl.BlockSpec((1, 1, tp), lambda i, j: (i, 0, j)),   # targets
                pl.BlockSpec((c, 1), lambda i, j: (0, 0)),          # weights
            ],
            out_specs=pl.BlockSpec((1, 2, 128), lambda i, j: (i, 0, j)),
        ),
        compiler_params=pltpu.CompilerParams(
            dimension_semantics=("parallel", "parallel"),
            vmem_limit_bytes=32 * 1024 * 1024,
        ),
    )(logits, tgt, weight)

    num = jnp.sum(partials[:, 0, :])
    den = jnp.sum(partials[:, 1, :])
    # size_average=True with class weights: weighted mean over valid pixels.
    # (If every pixel is ignored this is 0/0 = NaN, matching PyTorch.)
    return num / den


def _reference(inputs, targets, class_weight):
    n, c, h, w = inputs.shape
    logits = jnp.transpose(inputs, (0, 2, 3, 1)).reshape(-1, c).astype(jnp.float32)
    tgt = targets.reshape(-1).astype(jnp.int32)
    logp = jax.nn.log_softmax(logits, axis=-1)
    valid = tgt != IGNORE_INDEX
    safe_tgt = jnp.where(valid, tgt, 0)
    picked = jnp.take_along_axis(logp, safe_tgt[:, None], axis=-1)[:, 0]
    w_t = class_weight.astype(jnp.float32)[safe_tgt]
    num = jnp.sum(jnp.where(valid, -picked * w_t, 0.0))
    den = jnp.sum(jnp.where(valid, w_t, 0.0))
    return num / den


if __name__ == "__main__":
    key = jax.random.PRNGKey(0)
    k1, k2, k3, k4, k5, k6, k7 = jax.random.split(key, 7)

    # --- test 1: f32 logits, uint8 targets, small NCHW batch -----------------
    N, C, H, W = 2, 4, 16, 16
    x = jax.random.normal(k1, (N, C, H, W), dtype=jnp.float32)
    t = jax.random.randint(k2, (N, H, W), 0, C, dtype=jnp.int32)
    ign = jax.random.bernoulli(k3, 0.1, (N, H, W))
    t = jnp.where(ign, IGNORE_INDEX, t).astype(jnp.uint8)
    cw = jnp.array([1.0, 2.0, 0.5, 1.5], dtype=jnp.float32)

    loss = jax.block_until_ready(cross_entropy_loss_2d(x, t, cw))
    ref = _reference(x, t, cw)
    assert jnp.allclose(loss, ref, rtol=1e-5, atol=1e-5), (loss, ref)

    # --- test 2: ragged pixel count, int32 targets (in-kernel tail mask) -----
    N2, C2, H2, W2 = 1, 3, 10, 20                      # hw = 200, tile = 128
    x2 = jax.random.normal(k4, (N2, C2, H2, W2), dtype=jnp.float32)
    t2 = jax.random.randint(k5, (N2, H2, W2), 0, C2, dtype=jnp.int32)
    t2 = t2.at[0, 0, :5].set(IGNORE_INDEX)
    w2 = jnp.array([0.7, 1.3, 2.0], dtype=jnp.float32)

    loss2 = jax.block_until_ready(
        cross_entropy_loss_2d(x2, t2, w2, tile_pixels=128))
    ref2 = _reference(x2, t2, w2)
    assert jnp.allclose(loss2, ref2, rtol=1e-5, atol=1e-5), (loss2, ref2)

    # --- test 3: bf16 logits + uint8 targets, multi-tile grid ----------------
    N3, C3, H3, W3 = 1, 8, 32, 32                      # hw = 1024, tile = 256
    x3 = jax.random.normal(k6, (N3, C3, H3, W3), dtype=jnp.float32).astype(jnp.bfloat16)
    t3 = jax.random.randint(k7, (N3, H3, W3), 0, C3, dtype=jnp.int32)
    t3 = t3.at[0, :2, :].set(IGNORE_INDEX)
    t3 = t3.astype(jnp.uint8)
    w3 = jnp.linspace(0.5, 2.0, C3, dtype=jnp.float32)

    loss3 = jax.block_until_ready(
        cross_entropy_loss_2d(x3, t3, w3, tile_pixels=256))
    ref3 = _reference(x3.astype(jnp.float32), t3, w3)
    assert jnp.allclose(loss3, ref3, rtol=1e-5, atol=1e-4), (loss3, ref3)

    print("KERNEL_OK")
</pallas_src>

<mosaic_0001>
module attributes {stable_mosaic.version = 11 : i64} {
  func.func @_ce2d_kernel(%arg0: i32, %arg1: i32, %arg2: memref<1x4x256xf32, #tpu.memory_space<vmem>>, %arg3: memref<1x1x256xi8, #tpu.memory_space<vmem>>, %arg4: memref<4x1xf32, #tpu.memory_space<vmem>>, %arg5: memref<1x2x128xf32, #tpu.memory_space<vmem>>) attributes {dimension_semantics = [#tpu.dimension_semantics<parallel>, #tpu.dimension_semantics<parallel>], iteration_bounds = array<i64: 2, 1>, scalar_prefetch = 0 : i64, scratch_operands = 0 : i64, tpu.core_type = #tpu.core_type<tc>, window_params = [{transform_indices = @transform_0, window_bounds = array<i64: 1, 4, 256>}, {transform_indices = @transform_1, window_bounds = array<i64: 1, 1, 256>}, {pipeline_mode = #tpu.pipeline_mode<synchronous>, transform_indices = @transform_2, window_bounds = array<i64: 4, 1>}, {transform_indices = @transform_3, window_bounds = array<i64: 1, 2, 128>}]} {
    %c0 = arith.constant 0 : index
    %c0_0 = arith.constant 0 : index
    %c0_1 = arith.constant 0 : index
    %0 = vector.load %arg2[%c0, %c0_0, %c0_1] : memref<1x4x256xf32, #tpu.memory_space<vmem>>, vector<1x4x256xf32>
    %1 = vector.shape_cast %0 : vector<1x4x256xf32> to vector<4x256xf32>
    %c0_2 = arith.constant 0 : index
    %c0_3 = arith.constant 0 : index
    %c0_4 = arith.constant 0 : index
    %2 = vector.load %arg3[%c0_2, %c0_3, %c0_4] : memref<1x1x256xi8, #tpu.memory_space<vmem>>, vector<1x1x256xi8>
    %3 = vector.shape_cast %2 : vector<1x1x256xi8> to vector<1x256xi8>
    %4 = arith.extui %3 : vector<1x256xi8> to vector<1x256xi32>
    %c0_5 = arith.constant 0 : index
    %c0_6 = arith.constant 0 : index
    %5 = vector.load %arg4[%c0_5, %c0_6] : memref<4x1xf32, #tpu.memory_space<vmem>>, vector<4x1xf32>
    %cst = arith.constant dense<0xFF800000> : vector<256xf32>
    %6 = vector.multi_reduction <maximumf>, %1, %cst [0] : vector<4x256xf32> to vector<256xf32>
    %7 = vector.shape_cast %6 : vector<256xf32> to vector<1x256xf32>
    %8 = vector.broadcast %7 : vector<1x256xf32> to vector<4x256xf32>
    %9 = arith.subf %1, %8 : vector<4x256xf32>
    %10 = math.exp %9 : vector<4x256xf32>
    %cst_7 = arith.constant dense<0.000000e+00> : vector<256xf32>
    %11 = vector.multi_reduction <add>, %10, %cst_7 [0] : vector<4x256xf32> to vector<256xf32>
    %12 = vector.shape_cast %11 : vector<256xf32> to vector<1x256xf32>
    %13 = math.log %12 : vector<1x256xf32>
    %14 = arith.addf %13, %7 : vector<1x256xf32>
    %15 = tpu.iota {dimensions = array<i32: 0>} : vector<4x256xi32>
    %16 = vector.broadcast %4 : vector<1x256xi32> to vector<4x256xi32>
    %17 = arith.cmpi eq, %15, %16 : vector<4x256xi32>
    %cst_8 = arith.constant 0.000000e+00 : f32
    %18 = vector.shape_cast %5 : vector<4x1xf32> to vector<4x1xf32>
    %19 = vector.broadcast %18 : vector<4x1xf32> to vector<4x256xf32>
    %20 = vector.broadcast %cst_8 : f32 to vector<4x256xf32>
    %21 = arith.select %17, %19, %20 : vector<4x256xi1>, vector<4x256xf32>
    %cst_9 = arith.constant dense<0.000000e+00> : vector<256xf32>
    %22 = vector.multi_reduction <add>, %21, %cst_9 [0] : vector<4x256xf32> to vector<256xf32>
    %23 = vector.shape_cast %22 : vector<256xf32> to vector<1x256xf32>
    %cst_10 = arith.constant 0.000000e+00 : f32
    %24 = vector.broadcast %cst_10 : f32 to vector<4x256xf32>
    %25 = arith.select %17, %1, %24 : vector<4x256xi1>, vector<4x256xf32>
    %cst_11 = arith.constant dense<0.000000e+00> : vector<256xf32>
    %26 = vector.multi_reduction <add>, %25, %cst_11 [0] : vector<4x256xf32> to vector<256xf32>
    %27 = vector.shape_cast %26 : vector<256xf32> to vector<1x256xf32>
    %28 = tpu.iota {dimensions = array<i32: 1>} : vector<1x256xi32>
    %c256_i32 = arith.constant 256 : i32
    %29 = arith.muli %arg1, %c256_i32 : i32
    %30 = vector.broadcast %29 : i32 to vector<1x256xi32>
    %31 = arith.addi %28, %30 : vector<1x256xi32>
    %c255_i32 = arith.constant 255 : i32
    %32 = vector.broadcast %c255_i32 : i32 to vector<1x256xi32>
    %33 = arith.cmpi ne, %4, %32 : vector<1x256xi32>
    %c256_i32_12 = arith.constant 256 : i32
    %34 = vector.broadcast %c256_i32_12 : i32 to vector<1x256xi32>
    %35 = arith.cmpi slt, %31, %34 : vector<1x256xi32>
    %36 = arith.andi %33, %35 : vector<1x256xi1>
    %37 = arith.subf %14, %27 : vector<1x256xf32>
    %38 = arith.mulf %23, %37 : vector<1x256xf32>
    %cst_13 = arith.constant 0.000000e+00 : f32
    %39 = vector.broadcast %cst_13 : f32 to vector<1x256xf32>
    %40 = arith.select %36, %38, %39 : vector<1x256xi1>, vector<1x256xf32>
    %41 = vector.shape_cast %40 : vector<1x256xf32> to vector<1x1x256xf32>
    %cst_14 = arith.constant dense<0.000000e+00> : vector<1xf32>
    %42 = vector.multi_reduction <add>, %41, %cst_14 [1, 2] : vector<1x1x256xf32> to vector<1xf32>
    %43 = vector.shape_cast %42 : vector<1xf32> to vector<1x1x1xf32>
    %44 = vector.extract %43[0, 0, 0] : f32 from vector<1x1x1xf32>
    %cst_15 = arith.constant 0.000000e+00 : f32
    %45 = vector.broadcast %cst_15 : f32 to vector<1x256xf32>
    %46 = arith.select %36, %23, %45 : vector<1x256xi1>, vector<1x256xf32>
    %47 = vector.shape_cast %46 : vector<1x256xf32> to vector<1x1x256xf32>
    %cst_16 = arith.constant dense<0.000000e+00> : vector<1xf32>
    %48 = vector.multi_reduction <add>, %47, %cst_16 [1, 2] : vector<1x1x256xf32> to vector<1xf32>
    %49 = vector.shape_cast %48 : vector<1xf32> to vector<1x1x1xf32>
    %50 = vector.extract %49[0, 0, 0] : f32 from vector<1x1x1xf32>
    %51 = tpu.iota {dimensions = array<i32: 0>} : vector<2x128xi32>
    %c0_i32 = arith.constant 0 : i32
    %52 = vector.broadcast %c0_i32 : i32 to vector<2x128xi32>
    %53 = arith.cmpi eq, %51, %52 : vector<2x128xi32>
    %54 = vector.broadcast %44 : f32 to vector<2x128xf32>
    %55 = vector.broadcast %50 : f32 to vector<2x128xf32>
    %56 = arith.select %53, %54, %55 : vector<2x128xi1>, vector<2x128xf32>
    %c0_17 = arith.constant 0 : index
    %c0_18 = arith.constant 0 : index
    %c0_19 = arith.constant 0 : index
    %57 = vector.load %arg5[%c0_17, %c0_18, %c0_19] : memref<1x2x128xf32, #tpu.memory_space<vmem>>, vector<1x2x128xf32>
    %58 = vector.shape_cast %57 : vector<1x2x128xf32> to vector<2x128xf32>
    %59 = vector.shape_cast %56 : vector<2x128xf32> to vector<1x2x128xf32>
    tpu.vector_store %arg5[%c0_17, %c0_18, %c0_19], %59 {strides = array<i32>} : memref<1x2x128xf32, #tpu.memory_space<vmem>>, vector<1x2x128xf32>,
    return
  }
  func.func @transform_0(%arg0: i32, %arg1: i32) -> (i32, i32, i32) {
    %c0_i32 = arith.constant 0 : i32
    %c0_i32_0 = arith.constant 0 : i32
    return %arg0, %c0_i32, %arg1 : i32, i32, i32
  }
  func.func @transform_1(%arg0: i32, %arg1: i32) -> (i32, i32, i32) {
    %c0_i32 = arith.constant 0 : i32
    %c0_i32_0 = arith.constant 0 : i32
    return %arg0, %c0_i32, %arg1 : i32, i32, i32
  }
  func.func @transform_2(%arg0: i32, %arg1: i32) -> (i32, i32) {
    %c0_i32 = arith.constant 0 : i32
    %c0_i32_0 = arith.constant 0 : i32
    %c0_i32_1 = arith.constant 0 : i32
    return %c0_i32, %c0_i32_0 : i32, i32
  }
  func.func @transform_3(%arg0: i32, %arg1: i32) -> (i32, i32, i32) {
    %c0_i32 = arith.constant 0 : i32
    %c0_i32_0 = arith.constant 0 : i32
    return %arg0, %c0_i32, %arg1 : i32, i32, i32
  }
}

</mosaic_0001>

<bundles_post_ra>
// kernel: cross_entropy_loss_2d.1
= control target key start
LH: loop header
LB: loop body
LE: loop exit
PB: predicated region body
PF: predicated region fallthrough
CT: control target
= control target key end

     0   :  { %s617_s12 = smov 0   ;;  %s619_s13 = smov 0   ;;  %s712_s0 = inlined_call_operand.vmem [shape: f32[2,4,256], index: 0, kind: input, shape index: {}]   ;;  %s713_s1 = inlined_call_operand.vmem [shape: u8[2,1,256], index: 1, kind: input, shape index: {}]   ;;  %s714_s2 = inlined_call_operand.vmem [shape: f32[4,1], index: 2, kind: input, shape index: {}]   ;;  %s715_s3 = inlined_call_operand.vmem [shape: f32[2,2,128], index: 3, kind: output, shape index: {}]  }
   0x1   :  { %s621_s14 = smov 0  }
   0x2 LB: > { %s25_s15 = sadd.s32 1, %s589_s13  ;;  %p525_p0 = scmp.ge.s32.totalorder %s593_s14, 1  ;;  %s593_s14 = sphi %s621_s14, %s13_s14   ;;  %s589_s13 = sphi %s619_s13, %s717_s13   ;;  %s585_s12 = sphi %s617_s12, %s716_s12  }
   0x3   : > { %p27_p1 = scmp.ge.s32.totalorder %s25_s15, 2  ;;  %p174_p2 = scmp.lt.s32.totalorder %s593_s14, 3 }
   0x5   : > { %s719_s15 = smov (%p27_p1, %s25_s15), 0  ;;  %p175_p3 = pnand %p525_p0, %p174_p2 }
   0x6   : > { %v242_v0 = vld [vmem:[%s714_s2] sm:$0xf] (!%p175_p3)  ;;  %v595_v1 = vmov (!%p175_p3), 0   ;;  %p213_p4 = scmp.lt.s32.totalorder (!%p175_p3), %s585_s12, 1  ;;  %vm246_vm0 = vcmask (!%p175_p3), 1043456   ;;  %v291_v22 = vlaneseq (!%p175_p3)  ;;  %vm383_vm6 = vcmask (!%p175_p3), 1040384  }
   0x7   : > { %178 = sbr.rel (%p175_p3) target bundleno = 368 (0x170), region = 32  ;;  %563 = vset.pattern.permute.xlu0 (!%p175_p3), %v595_v1 }
   0x8   : > { %313 = vperm.xlu0 (!%p175_p3), %563, %v242_v0   ;;  %v658_v25 = vshrl.u32 (!%p175_p3), %v291_v22, 7 }
   0xa   : > { %v663_v29 = vsub.s32 (!%p175_p3), 0, %v658_v25  ;;  %v666_v30 = vsub.s32 (!%p175_p3), 4, %v658_v25  ;;  %vm424_vm7 = vcmp.eq.s32.totalorder (!%p175_p3), %v658_v25, 0 }
   0xe   : > { %s721_s12 = smov (!%p213_p4, %s585_s12), 1 }
   0xf   : > { %s532_s18 = sshll.u32 %s721_s12, 3  ;;  %s528_s22 = sshll.u32 %s721_s12, 1 }
  0x10   : > { %s220_s21 = scalar_lea.vmem %s712_s0, %s532_s18  ;;  %s229_s25 = scalar_lea.vmem %s713_s1, %s528_s22 }
  0x11   : > { %v238_v2 = vld [vmem:[%s220_s21] sm:$0xff]  ;;  %s237_s29 = scalar_lea.vmem %s715_s3, %s528_s22 }
  0x12   : > { %v244_v3 = vcombine.high %v238_v2, %v238_v2  ;;  %v247_v4 = vsel %vm246_vm0, %v238_v2, -inf  ;;  %v239_v23 = vld [vmem:[%s229_s25] sm:$0x3] }
  0x13   : > { %v248_v6 = vrot.slane %v247_v4, 4  ;;  %v240_v26 = vunpack.c.0.s8 %v239_v23 }
  0x14   : > { %v254_v5 = vsel %vm246_vm0, %v244_v3, -inf }
  0x15   : > { %v255_v7 = vrot.slane %v254_v5, 4  ;;  %v249_v8 = vmax.f32 %v247_v4, %v248_v6  ;;  %v668_v31 = vand.u32 255, %v240_v26 }
  0x17   : > { %v256_v9 = vmax.f32 %v254_v5, %v255_v7  ;;  %v250_v10 = vrot.slane %v249_v8, 2  ;;  %v296_v34 = vrot.slane %v668_v31, %v663_v29  ;;  %v300_v35 = vrot.slane %v668_v31, %v666_v30 }
  0x18   : > { %vm355_vm3 = vcmp.ne.s32.totalorder %v668_v31, 255 }
  0x19   : > { %v257_v11 = vrot.slane %v256_v9, 2  ;;  %v251_v12 = vmax.f32 %v249_v8, %v250_v10  ;;  %v304_v38 = vrot.slane %v296_v34, %v663_v29  ;;  %v308_v39 = vrot.slane %v300_v35, %v663_v29 }
  0x1b   : > { %v258_v13 = vmax.f32 %v256_v9, %v257_v11  ;;  %v252_v14 = vrot.slane %v251_v12, 1  ;;  %vm309_vm1 = vcmp.eq.s32.totalorder %v658_v25, %v304_v38  ;;  %vm310_vm2 = vcmp.eq.s32.totalorder %v658_v25, %v308_v39 }
  0x1c   : > { %v332_v44 = vsel %vm309_vm1, %v238_v2, 0.0  ;;  %v333_v45 = vsel %vm310_vm2, %v244_v3, 0.0 }
  0x1d   : > { %v259_v15 = vrot.slane %v258_v13, 1  ;;  %v646_v16 = vmax.f32 %v251_v12, %v252_v14  ;;  %v334_v48 = vsel %vm246_vm0, %v332_v44, 0.0  ;;  %v341_v49 = vsel %vm246_vm0, %v333_v45, 0.0 }
  0x1e   : > { %v335_v51 = vrot.slane %v334_v48, 4  ;;  %v342_v52 = vrot.slane %v341_v49, 4 }
  0x1f   : > { %v648_v17 = vmax.f32 %v258_v13, %v259_v15  ;;  %v596_v13 = vmov 1  }
  0x20   : > { %v336_v54 = vadd.f32 %v335_v51, %v334_v48  ;;  %v343_v55 = vadd.f32 %v342_v52, %v341_v49  ;;  %v360_v14 = vcombine.low %v596_v13, %v596_v13 }
  0x21   : > { %v263_v18 = vcombine.low %v646_v16, %v648_v17 }
  0x22   : > { %v337_v56 = vrot.slane %v336_v54, 2  ;;  %v344_v57 = vrot.slane %v343_v55, 2  ;;  %vm361_vm4 = vcmp.ne.s32.totalorder %v360_v14, 0 }
  0x23   : > { %v265_v19 = vsub.f32 %v238_v2, %v263_v18  ;;  %vm362_vm5 = vmand %vm355_vm3, %vm361_vm4 }
  0x24   : > { %v338_v58 = vadd.f32 %v337_v56, %v336_v54  ;;  %v345_v59 = vadd.f32 %v344_v57, %v343_v55 }
  0x25   : > { %v266_v20 = vmul.f32 1.442695, %v265_v19 }
  0x26   : > { %v339_v3 = vrot.slane %v338_v58, 1  ;;  %v346_v4 = vrot.slane %v345_v59, 1 }
  0x27   : > { %565 = vpow2.f32 %v266_v20 }
  0x28   : > { %v340_v11 = vadd.f32 %v339_v3, %v338_v58  ;;  %v347_v12 = vadd.f32 %v346_v4, %v345_v59 }
  0x31   : > { %v566_v21 = vpop.eup %565 }
  0x32   : > { %v269_v24 = vcombine.high %v566_v21, %v566_v21  ;;  %v271_v27 = vsel %vm246_vm0, %v566_v21, 0.0 }
  0x33   : > { %v272_v32 = vrot.slane %v271_v27, 4 }
  0x34   : > { %v278_v28 = vsel %vm246_vm0, %v269_v24, 0.0 }
  0x35   : > { %v279_v33 = vrot.slane %v278_v28, 4  ;;  %v273_v36 = vadd.f32 %v272_v32, %v271_v27 }
  0x37   : > { %v280_v37 = vadd.f32 %v279_v33, %v278_v28  ;;  %v274_v40 = vrot.slane %v273_v36, 2 }
  0x39   : > { %v281_v41 = vrot.slane %v280_v37, 2  ;;  %v275_v42 = vadd.f32 %v274_v40, %v273_v36 }
  0x3b   : > { %v282_v43 = vadd.f32 %v281_v41, %v280_v37  ;;  %v276_v46 = vrot.slane %v275_v42, 1 }
  0x3d   : > { %v283_v47 = vrot.slane %v282_v43, 1  ;;  %v277_v50 = vadd.f32 %v276_v46, %v275_v42 }
  0x3f   : > { %v284_v53 = vadd.f32 %v283_v47, %v282_v43  ;;  %567 = vlog2.f32 %v277_v50 }
  0x41   : > { %569 = vlog2.f32 %v284_v53 }
  0x49   : > { %v568_v60 = vpop.eup %567 }
  0x4a   : > { %v286_v7 = vmul.f32 0.6931472, %v568_v60 }
  0x4b   : > { %v570_v61 = vpop.eup %569 }
  0x4c   : > { %v288_v8 = vmul.f32 0.6931472, %v570_v61  ;;  %v289_v19 = vadd.f32 %v286_v7, %v646_v16 }
  0x4e   : > { %v290_v20 = vadd.f32 %v288_v8, %v648_v17  ;;  %v363_v26 = vsub.f32 %v289_v19, %v340_v11 }
  0x50   : > { %v364_v27 = vsub.f32 %v290_v20, %v347_v12 }
  0x87   : > { %v314_v62 = vpop.permute.xlu0 %313 }
  0x88   : > { %v316_v63 = vsel %vm309_vm1, %v314_v62, 0.0  ;;  %v317_v0 = vsel %vm310_vm2, %v314_v62, 0.0 }
  0x89   : > { %v318_v1 = vsel %vm246_vm0, %v316_v63, 0.0  ;;  %v325_v2 = vsel %vm246_vm0, %v317_v0, 0.0 }
  0x8a   : > { %v319_v5 = vrot.slane %v318_v1, 4  ;;  %v326_v6 = vrot.slane %v325_v2, 4 }
  0x8c   : > { %v320_v9 = vadd.f32 %v319_v5, %v318_v1  ;;  %v327_v10 = vadd.f32 %v326_v6, %v325_v2 }
  0x8e   : > { %v321_v15 = vrot.slane %v320_v9, 2  ;;  %v328_v18 = vrot.slane %v327_v10, 2 }
  0x90   : > { %v322_v21 = vadd.f32 %v321_v15, %v320_v9  ;;  %v329_v22 = vadd.f32 %v328_v18, %v327_v10 }
  0x92   : > { %v323_v23 = vrot.slane %v322_v21, 1  ;;  %v330_v24 = vrot.slane %v329_v22, 1 }
  0x94   : > { %v324_v28 = vadd.f32 %v323_v23, %v322_v21  ;;  %v331_v32 = vadd.f32 %v330_v24, %v329_v22 }
  0x96   : > { %v398_v33 = vcombine.low %v324_v28, %v331_v32  ;;  %v365_v34 = vmul.f32 %v363_v26, %v324_v28  ;;  %v366_v35 = vmul.f32 %v364_v27, %v331_v32 }
  0x98   : > { %v400_v36 = vsel %vm362_vm5, %v398_v33, 0.0  ;;  %v369_v16 = vcombine.low %v365_v34, %v366_v35 }
  0x99   : > { %v405_v17 = vrot.slane %v400_v36, %v663_v29  ;;  %v409_v37 = vrot.slane %v400_v36, %v666_v30 }
  0x9a   : > { %v371_v38 = vsel %vm362_vm5, %v369_v16, 0.0 }
  0x9b   : > { %v412_v31 = vsel %vm383_vm6, %v405_v17, 0.0  ;;  %v413_v39 = vsel %vm383_vm6, %v409_v37, 0.0  ;;  %v376_v40 = vrot.slane %v371_v38, %v663_v29  ;;  %v380_v41 = vrot.slane %v371_v38, %v666_v30 }
  0x9c   : > { %v414_v42 = vadd.f32 %v413_v39, %v412_v31 }
  0x9d   : > { %v384_v43 = vsel %vm383_vm6, %v376_v40, 0.0  ;;  %v385_v44 = vsel %vm383_vm6, %v380_v41, 0.0 }
  0x9e   : > { %415 = vadd.xlane.f32.xlu1 %v414_v42  ;;  %v386_v45 = vadd.f32 %v385_v44, %v384_v43 }
  0xa0   : > { %387 = vadd.xlane.f32.xlu0 %v386_v45 }
 0x12b   : > { %v416_v46 = vpop.xlane.xlu1 %415 }
 0x12c   : > { %v417_v47 = vrot.slane %v416_v46, 4 }
 0x12d   : > { %v388_v48 = vpop.xlane.xlu0 %387 }
 0x12e   : > { %v418_v49 = vadd.f32 %v417_v47, %v416_v46  ;;  %v389_v50 = vrot.slane %v388_v48, 4 }
 0x130   : > { %v419_v51 = vrot.slane %v418_v49, 2  ;;  %v390_v52 = vadd.f32 %v389_v50, %v388_v48 }
 0x132   : > { %v420_v53 = vadd.f32 %v419_v51, %v418_v49  ;;  %v391_v54 = vrot.slane %v390_v52, 2 }
 0x134   : > { %v392_v55 = vadd.f32 %v391_v54, %v390_v52  ;;  %v421_v29 = vrot.slane %v420_v53, 1 }
 0x136   : > { %v393_v56 = vrot.slane %v392_v55, 1  ;;  %v422_v57 = vadd.f32 %v421_v29, %v420_v53 }
 0x138   : > { %v394_v30 = vadd.f32 %v393_v56, %v392_v55 }
 0x13a   : > { %533 = vpush %v394_v30 }
 0x13b   : > { %535 = vpush %v422_v57 }
 0x16b   : > { %s534_s26 = spop %533 }
 0x16c   : > { %v425_v58 = vstv %s534_s26  ;;  %s536_s30 = spop %535 }
 0x16d   : > { %v426_v59 = vstv %s536_s30 }
 0x16e   : > { %v427_v60 = vsel %vm424_vm7, %v425_v58, %v426_v59 }
 0x16f   : > { %428 = vst [vmem:[%s237_s29] sm:$0x3] %v427_v60 }
 0x170 PF: > { %s13_s14 = sadd.s32 1, %s593_s14   ;;  %s716_s12 = smov %s589_s13 }
 0x171   : > { %p10_p5 = scmp.ge.s32.totalorder %s13_s14, 4   ;;  %s717_s13 = smov %s719_s15 }
 0x173   :  { %12 = sbr.rel (!%p10_p5) target bundleno = 2 (0x2), region = 65 }

</bundles_post_ra>
